<compile_context>
chip_gen: v6e
topology: v6e:2x2x1
jax: 0.10.0
libtpu: 0.0.40
codegen_flags: <defaults>
</compile_context>

<pallas_src>
import functools

import jax
import jax.numpy as jnp
import numpy as np
from jax.experimental import pallas as pl
from jax.experimental.pallas import tpu as pltpu


HIDDEN = 11
DEFAULT_TILE_B = 8192   # rows per grid step; sweep 4096-8192 (v7x cap ~8192)


def _round_up(n, m):
    return ((n + m - 1) // m) * m


def _choose_tile(batch, max_tile):
    """Pick (padded_batch, tile_b).

    Single tile for small batches (block == full array, no 128 constraint);
    otherwise tile_b is a multiple of 128 (it is the lane axis of the output)
    and we aim for >= 2 grid steps so v7x megacore has work to split.
    """
    b8 = _round_up(batch, 8)
    if b8 <= 256:
        return b8, b8
    tb = min(max_tile, _round_up(-(-b8 // 2), 128))
    tb = max(tb, 128)
    b_pad = _round_up(b8, tb)
    return b_pad, tb


def _make_kernel(D, H):
    """MLP kernel in batch-on-lanes orientation.

    x_ref : (tb, D)            streamed batch tile (natural HBM layout)
    p_ref : (H, D + H + 4)     packed params:
                               [ w1^T | b1 | w2^T | b2 | w3 | b3(row 0) ]
    o_ref : (1, tb)            lane-dense logits slab
    """
    def kernel(x_ref, p_ref, o_ref):
        P = p_ref[...]
        w1t = P[:, 0:D]                       # (H, D)
        b1 = P[:, D:D + 1]                    # (H, 1)
        w2t = P[:, D + 1:D + 1 + H]           # (H, H)
        b2 = P[:, D + 1 + H:D + 2 + H]        # (H, 1)
        w3c = P[:, D + 2 + H:D + 3 + H]       # (H, 1)
        b3 = P[0:1, D + 3 + H:D + 4 + H]      # (1, 1)

        # Flip the streamed tile once (XLU); everything downstream is
        # (features, batch) with batch dense on the 128 lanes.
        xt = x_ref[...].T                                          # (D, tb)

        # ---- Linear(D, 11) + ReLU  (MXU, f32 accumulate) ----
        h1 = jnp.dot(w1t, xt, preferred_element_type=jnp.float32)  # (H, tb)
        h1 = jnp.maximum(h1 + b1, 0.0)

        # ---- Linear(11, 11) + ReLU  (MXU) ----
        h2 = jnp.dot(w2t, h1, preferred_element_type=jnp.float32)  # (H, tb)
        h2 = jnp.maximum(h2 + b2, 0.0)

        # ---- Linear(11, 1): VPU multiply + sublane (XLU) reduction ----
        logits = jnp.sum(h2 * w3c, axis=0, keepdims=True) + b3     # (1, tb)
        o_ref[...] = logits.astype(o_ref.dtype)

    return kernel


@functools.partial(jax.jit, static_argnames=("max_tile_b",))
def _forward_impl(x, packed, *, max_tile_b):
    B, D = x.shape
    H = HIDDEN

    b_pad, tb = _choose_tile(B, max_tile_b)
    if b_pad != B:
        x = jnp.pad(x, ((0, b_pad - B), (0, 0)))
    n_tiles = b_pad // tb

    flops = 2 * b_pad * (D * H + H * H + H)
    bytes_accessed = b_pad * (D + 1) * 4 + packed.size * 4

    out = pl.pallas_call(
        _make_kernel(D, H),
        out_shape=jax.ShapeDtypeStruct((1, b_pad), jnp.float32),
        grid=(n_tiles,),
        in_specs=[
            # Stream x by batch tile (rows on sublanes in VMEM; DMA moves only
            # the real D*4 bytes/row -- lane padding costs VMEM, not bandwidth).
            pl.BlockSpec((tb, D), lambda i: (i, 0)),
            # Packed params: constant index_map -> DMA'd once, VMEM-resident.
            pl.BlockSpec(packed.shape, lambda i: (0, 0)),
        ],
        # Lane-dense output slab: unmasked vst, tb/1024 stores per tile.
        out_specs=pl.BlockSpec((1, tb), lambda i: (0, i)),
        compiler_params=pltpu.CompilerParams(
            dimension_semantics=("parallel",),          # megacore on v7x
            vmem_limit_bytes=32 * 1024 * 1024,          # tb=8192 ~10 MiB w/ padding
        ),
        cost_estimate=pl.CostEstimate(
            flops=flops, transcendentals=0, bytes_accessed=bytes_accessed),
    )(x, packed)

    return out[0, :B].reshape(B, 1)


def neural_network_forward(x, params, *, max_tile_b=DEFAULT_TILE_B):
    """3-layer MLP forward pass as one batch-tiled Pallas kernel."""
    w1, b1, w2, b2, w3, b3 = params
    B, D = x.shape
    H = w1.shape[1]

    # Pack all parameters into a single (H, D+H+4) f32 buffer:
    #   [:, 0:D]        = w1^T
    #   [:, D]          = b1
    #   [:, D+1:D+1+H]  = w2^T
    #   [:, D+1+H]      = b2
    #   [:, D+2+H]      = w3 (column)
    #   [0, D+3+H]      = b3 (scalar)
    packed = jnp.zeros((H, D + H + 4), jnp.float32)
    packed = packed.at[:, 0:D].set(w1.T)
    packed = packed.at[:, D:D + 1].set(b1.reshape(H, 1))
    packed = packed.at[:, D + 1:D + 1 + H].set(w2.T)
    packed = packed.at[:, D + 1 + H:D + 2 + H].set(b2.reshape(H, 1))
    packed = packed.at[:, D + 2 + H:D + 3 + H].set(w3.reshape(H, 1))
    packed = packed.at[0, D + 3 + H].set(b3.reshape(()))

    return _forward_impl(x, packed, max_tile_b=max_tile_b)


def init_params(key, input_dim):
    """PyTorch-style uniform(+-1/sqrt(fan_in)) init.

    Weights are (in_features, out_features); biases are (1, out_features).
    """
    def linear(key, fan_in, fan_out):
        kw, kb = jax.random.split(key)
        bound = 1.0 / np.sqrt(fan_in)
        w = jax.random.uniform(kw, (fan_in, fan_out), jnp.float32,
                               minval=-bound, maxval=bound)
        b = jax.random.uniform(kb, (1, fan_out), jnp.float32,
                               minval=-bound, maxval=bound)
        return w, b

    k1, k2, k3 = jax.random.split(key, 3)
    w1, b1 = linear(k1, input_dim, HIDDEN)
    w2, b2 = linear(k2, HIDDEN, HIDDEN)
    w3, b3 = linear(k3, HIDDEN, 1)
    return (w1, b1, w2, b2, w3, b3)


def reference_forward(x, params):
    """Plain-JAX reference for correctness checking."""
    w1, b1, w2, b2, w3, b3 = params
    h1 = jnp.maximum(x @ w1 + b1, 0.0)
    h2 = jnp.maximum(h1 @ w2 + b2, 0.0)
    return h2 @ w3 + b3


if __name__ == "__main__":
    INPUT_DIM = 16   # stand-in for process.X_train.shape[1]
    BATCH = 8

    key = jax.random.PRNGKey(0)
    kx, kp, kx2 = jax.random.split(key, 3)

    params = init_params(kp, INPUT_DIM)

    # Small single-tile case.
    x = jax.random.normal(kx, (BATCH, INPUT_DIM), dtype=jnp.float32)
    out = jax.block_until_ready(neural_network_forward(x, params))
    ref = reference_forward(x, params)
    np.testing.assert_allclose(np.asarray(out), np.asarray(ref),
                               rtol=1e-5, atol=1e-5)
    assert out.shape == (BATCH, 1)

    # Multi-tile + padding path (B=300, max_tile=128 -> tb=128, grid of 3,
    # 84 padded rows sliced off).
    x2 = jax.random.normal(kx2, (300, INPUT_DIM), dtype=jnp.float32)
    out2 = jax.block_until_ready(
        neural_network_forward(x2, params, max_tile_b=128))
    ref2 = reference_forward(x2, params)
    np.testing.assert_allclose(np.asarray(out2), np.asarray(ref2),
                               rtol=1e-5, atol=1e-5)
    assert out2.shape == (300, 1)

    print("KERNEL_OK")
</pallas_src>

<mosaic_0001>
module attributes {stable_mosaic.version = 11 : i64} {
  func.func @kernel(%arg0: i32, %arg1: memref<8x16xf32, #tpu.memory_space<vmem>>, %arg2: memref<11x31xf32, #tpu.memory_space<vmem>>, %arg3: memref<1x8xf32, #tpu.memory_space<vmem>>) attributes {dimension_semantics = [#tpu.dimension_semantics<parallel>], iteration_bounds = array<i64: 1>, scalar_prefetch = 0 : i64, scratch_operands = 0 : i64, tpu.core_type = #tpu.core_type<tc>, window_params = [{transform_indices = @transform_0, window_bounds = array<i64: 8, 16>}, {pipeline_mode = #tpu.pipeline_mode<synchronous>, transform_indices = @transform_1, window_bounds = array<i64: 11, 31>}, {transform_indices = @transform_2, window_bounds = array<i64: 1, 8>}]} {
    %c0 = arith.constant 0 : index
    %c0_0 = arith.constant 0 : index
    %0 = vector.load %arg2[%c0, %c0_0] : memref<11x31xf32, #tpu.memory_space<vmem>>, vector<11x31xf32>
    %1 = vector.extract_strided_slice %0 {offsets = [0, 0], sizes = [11, 16], strides = [1, 1]} : vector<11x31xf32> to vector<11x16xf32>
    %2 = vector.extract_strided_slice %0 {offsets = [0, 16], sizes = [11, 1], strides = [1, 1]} : vector<11x31xf32> to vector<11x1xf32>
    %3 = vector.extract_strided_slice %0 {offsets = [0, 17], sizes = [11, 11], strides = [1, 1]} : vector<11x31xf32> to vector<11x11xf32>
    %4 = vector.extract_strided_slice %0 {offsets = [0, 28], sizes = [11, 1], strides = [1, 1]} : vector<11x31xf32> to vector<11x1xf32>
    %5 = vector.extract_strided_slice %0 {offsets = [0, 29], sizes = [11, 1], strides = [1, 1]} : vector<11x31xf32> to vector<11x1xf32>
    %6 = vector.extract_strided_slice %0 {offsets = [0, 30], sizes = [1, 1], strides = [1, 1]} : vector<11x31xf32> to vector<1x1xf32>
    %c0_1 = arith.constant 0 : index
    %c0_2 = arith.constant 0 : index
    %7 = vector.load %arg1[%c0_1, %c0_2] : memref<8x16xf32, #tpu.memory_space<vmem>>, vector<8x16xf32>
    %8 = tpu.transpose %7, [1, 0] : vector<8x16xf32> -> vector<16x8xf32>
    %cst = arith.constant dense<0.000000e+00> : vector<11x8xf32>
    %9 = tpu.matmul %1, %8, %cst {dimension_numbers = #tpu.dot_dimension_numbers<[1], [0], [0], [1], [0, 0, 1, 1], [], []>} : vector<11x16xf32>, vector<16x8xf32>, vector<11x8xf32> -> vector<11x8xf32>
    %10 = vector.broadcast %2 : vector<11x1xf32> to vector<11x8xf32>
    %11 = arith.addf %9, %10 : vector<11x8xf32>
    %cst_3 = arith.constant 0.000000e+00 : f32
    %12 = vector.broadcast %cst_3 : f32 to vector<11x8xf32>
    %13 = arith.maximumf %11, %12 : vector<11x8xf32>
    %cst_4 = arith.constant dense<0.000000e+00> : vector<11x8xf32>
    %14 = tpu.matmul %3, %13, %cst_4 {dimension_numbers = #tpu.dot_dimension_numbers<[1], [0], [0], [1], [0, 0, 1, 1], [], []>} : vector<11x11xf32>, vector<11x8xf32>, vector<11x8xf32> -> vector<11x8xf32>
    %15 = vector.broadcast %4 : vector<11x1xf32> to vector<11x8xf32>
    %16 = arith.addf %14, %15 : vector<11x8xf32>
    %cst_5 = arith.constant 0.000000e+00 : f32
    %17 = vector.broadcast %cst_5 : f32 to vector<11x8xf32>
    %18 = arith.maximumf %16, %17 : vector<11x8xf32>
    %19 = vector.broadcast %5 : vector<11x1xf32> to vector<11x8xf32>
    %20 = arith.mulf %18, %19 : vector<11x8xf32>
    %cst_6 = arith.constant dense<0.000000e+00> : vector<8xf32>
    %21 = vector.multi_reduction <add>, %20, %cst_6 [0] : vector<11x8xf32> to vector<8xf32>
    %22 = vector.shape_cast %21 : vector<8xf32> to vector<1x8xf32>
    %23 = vector.broadcast %6 : vector<1x1xf32> to vector<1x8xf32>
    %24 = arith.addf %22, %23 : vector<1x8xf32>
    %c0_7 = arith.constant 0 : index
    %c0_8 = arith.constant 0 : index
    %25 = vector.load %arg3[%c0_7, %c0_8] : memref<1x8xf32, #tpu.memory_space<vmem>>, vector<1x8xf32>
    tpu.vector_store %arg3[%c0_7, %c0_8], %24 {strides = array<i32>} : memref<1x8xf32, #tpu.memory_space<vmem>>, vector<1x8xf32>,
    return
  }
  func.func @transform_0(%arg0: i32) -> (i32, i32) {
    %c0_i32 = arith.constant 0 : i32
    %c0_i32_0 = arith.constant 0 : i32
    return %arg0, %c0_i32 : i32, i32
  }
  func.func @transform_1(%arg0: i32) -> (i32, i32) {
    %c0_i32 = arith.constant 0 : i32
    %c0_i32_0 = arith.constant 0 : i32
    %c0_i32_1 = arith.constant 0 : i32
    return %c0_i32, %c0_i32_0 : i32, i32
  }
  func.func @transform_2(%arg0: i32) -> (i32, i32) {
    %c0_i32 = arith.constant 0 : i32
    %c0_i32_0 = arith.constant 0 : i32
    return %c0_i32, %arg0 : i32, i32
  }
}

</mosaic_0001>

<bundles_post_ra>
// kernel: _forward_impl.1
= control target key start
LH: loop header
LB: loop body
LE: loop exit
PB: predicated region body
PF: predicated region fallthrough
CT: control target
= control target key end

     0   :  { %7 = vsyncpa [#allocation3], 0  ;;  %s422_s0 = inlined_call_operand.hbm [shape: f32[8,16], index: 0, kind: input, shape index: {}]   ;;  %s423_s1 = inlined_call_operand.hbm [shape: f32[11,31], index: 1, kind: input, shape index: {}]   ;;  %s424_s2 = inlined_call_operand.hbm [shape: f32[1,8], index: 2, kind: output, shape index: {}]  }
   0x1   :  { %8 = vsyncpa [#allocation6], 0 }
   0x2   :  { %9 = vsyncpa [#allocation4], 0  ;;  %s386_s9 = smov [#allocation2]   ;;  %s387_s11 = smov [#allocation5]  }
   0x3   :  { %s16_s10 = sshll.u32 %s386_s9, 4  ;;  %s25_s12 = sshll.u32 %s387_s11, 4  ;;  %s17_s10 = int_to_ptr.vmem [resolvable:$true] %s16_s10  ;;  %s26_s12 = int_to_ptr.vmem [resolvable:$true] %s25_s12 }
   0x4   :  { %s328_s13 = scalar_lea.vmem %s17_s10, 128  ;;  %p333_p1 = scmp.lt.s32.totalorder %s17_s10, %s17_s10 }
   0x5   :  { %p329_p0 = scmp.ne.s32.totalorder %s17_s10, %s328_s13  ;;  %p334_p2 = scmp.lt.s32.totalorder %s328_s13, %s328_s13 }
   0x7   :  { %p335_p3 = por %p334_p2, %p333_p1 }
   0x9   :  { %p336_p4 = pnand %p335_p3, %p329_p0 }
   0xb   :  { %339 = shalt.err (!%p336_p4)
}
   0xc   :  { %19 = dma.hbm_to_vmem [thread:$0]  %s422_s0, 128, %s17_s10, [#allocation3]  }
   0xd   :  { %s348_s16 = scalar_lea.vmem %s26_s12, 256  ;;  %p353_p6 = scmp.lt.s32.totalorder %s26_s12, %s26_s12 }
   0xe   :  { %p349_p5 = scmp.ne.s32.totalorder %s26_s12, %s348_s16  ;;  %p354_p7 = scmp.lt.s32.totalorder %s348_s16, %s348_s16 }
  0x10   :  { %p355_p8 = por %p354_p7, %p353_p6 }
  0x12   :  { %p356_p9 = pnand %p355_p8, %p349_p5 }
  0x14   :  { %359 = shalt.err (!%p356_p9)
}
  0x15   :  { %s388_s17 = smov 128   ;;  %s389_s18 = smov 8  }
  0x16   :  { %31 = dma.hbm_to_vmem [thread:$0]  %s423_s1, 256, %s26_s12, [#allocation6], %s388_s17, %s388_s17, %s389_s18  }
  0x17   :  { %380 = dma.done.wait [#allocation3], 128  }
  0x18   :  { %381 = vsyncadd [#allocation3], 4294967168 }
  0x19   :  { %382 = dma.done.wait [#allocation6], 256  }
  0x1a   :  { %383 = vsyncadd [#allocation6], 4294967040  ;;  %v390_v0 = vmov 16   ;;  %vm51_vm0 = vcmask 130048   ;;  %v40_v1 = vld [vmem:[#allocation2] sm:$0xff]  ;;  %v38_v2 = vld [vmem:[#allocation5] sm:$0xff] }
  0x1b   :  { %313 = vset.pattern.permute.xlu0 %v390_v0  ;;  %291 = vmatprep.subr.msk.mxu0 %vm51_vm0, %v40_v1  ;;  %v39_v3 = vld [vmem:[#allocation5 + $0x8] sm:$0x7]  ;;  %s391_s0 = smov 111   ;;  %v392_v4 = vmov 28   ;;  %v393_v5 = vmov 29   ;;  %v394_v6 = vmov 30  }
  0x1c   :  { %293 = vmatprep.mubr.msk.f32.mxu0 %vm51_vm0, %v38_v2  ;;  %292 = vmatpush3.xpose.msk.msra.mxu0 %vm51_vm0, %v40_v1  ;;  %vm148_vm1 = vcmask 89088   ;;  %vm153_vm2 = vcmask 1042432   ;;  %vm246_vm3 = vcmask 59392   ;;  %vm244_vm4 = vcmask 64512   ;;  %s395_s1 = smov [#allocation7]  }
  0x1d   :  { %48 = vperm.xlu0 %313, %v39_v3   ;;  %144 = vrot.lane.b32.xlu1 %v38_v2, %s391_s0  ;;  %s268_s21 = sshll.u32 %s395_s1, 4  ;;  %vm260_vm5 = vcmask 57344   ;;  %s269_s21 = int_to_ptr.vmem [resolvable:$true] %s268_s21 }
  0x1e   :  { %315 = vset.pattern.permute.xlu1 %v392_v4  ;;  %s360_s22 = scalar_lea.vmem %s269_s21, 16  ;;  %s364_s23 = scalar_lea.vmem %s269_s21, 32 }
  0x1f   :  { %294 = vmatmul.mubr.msk.f32.vlgmr.msra.gmra.mxu0 %vm51_vm0, %v39_v3  ;;  %p361_p10 = scmp.ne.s32.totalorder %s269_s21, %s360_s22  ;;  %p365_p11 = scmp.lt.s32.totalorder %s269_s21, %s269_s21 }
  0x20   :  { %p366_p12 = scmp.lt.s32.totalorder %s364_s23, %s360_s22 }
  0x21   :  { %43 = vperm.xlu0 %313, %v38_v2   ;;  %146 = vrot.lane.b32.xlu1 %v39_v3, %s391_s0 }
  0x22   :  { %p367_p13 = por %p366_p12, %p365_p11 }
  0x24   :  { %p368_p0 = pnand %p367_p13, %p361_p10 }
  0x25   :  { %314 = vset.pattern.permute.xlu0 %v392_v4  ;;  %141 = vperm.xlu1 %315, %v39_v3  }
  0x26   :  { %137 = vperm.xlu0 %314, %v38_v2  }
  0x29   :  { %316 = vset.pattern.permute.xlu1 %v393_v5 }
  0x2a   :  { %317 = vset.pattern.permute.xlu0 %v393_v5  ;;  %235 = vperm.xlu1 %316, %v38_v2  }
  0x2b   :  { %239 = vperm.xlu0 %317, %v39_v3  }
  0x2e   :  { %318 = vset.pattern.permute.xlu1 %v394_v6 }
  0x2f   :  { %319 = vset.pattern.permute.xlu0 %v394_v6  ;;  %256 = vperm.xlu1 %318, %v38_v2  }
  0x8f   :  { %v145_v7 = vpop.permute.xlu1 %144 }
  0x90   :  { %300 = vmatprep.mubr.msk.f32.mxu1 %vm148_vm1, %v145_v7 }
  0x93   :  { %v147_v16 = vpop.permute.xlu1 %146 }
  0x98   :  { %v49_v8 = vpop.permute.xlu0 %48 }
  0x9c   :  { %v44_v11 = vpop.permute.xlu0 %43 }
  0xa0   :  { %v142_v18 = vpop.permute.xlu1 %141 }
  0xa1   :  { %v138_v17 = vpop.permute.xlu0 %137 }
  0xa5   :  { %v236_v25 = vpop.permute.xlu1 %235 }
  0xa6   :  { %v240_v22 = vpop.permute.xlu0 %239 }
  0xaa   :  { %v257_v37 = vpop.permute.xlu1 %256 }
  0xdf   :  { %v295_v9 = vpop.f32.mrf.mxu0 }
  0xe0   :  { %v131_v10 = vadd.f32 %v295_v9, %v49_v8 }
  0xe1   :  { %v125_v12 = vpop.f32.mrf.mxu0 }
  0xe2   :  { %v135_v13 = vmax.f32 %v131_v10, 0.0  ;;  %v126_v14 = vadd.f32 %v125_v12, %v44_v11 }
  0xe4   :  { %v134_v15 = vmax.f32 %v126_v14, 0.0  ;;  %296 = vmatprep.subr.msk.mxu1 %vm153_vm2, %v135_v13 }
  0xe5   :  { %297 = vmatpush3.msk.msra.mxu1 %vm153_vm2, %v135_v13 }
  0xe6   :  { %298 = vmatprep.subr.mxu1 %v134_v15 }
  0xe7   :  { %299 = vmatpush3.msra.mxu1 %v134_v15 }
  0xe8   :  { %301 = vmatmul.mubr.msk.f32.vlgmr.msra.gmra.mxu1 %vm148_vm1, %v147_v16 }
 0x1a8   :  { %v302_v19 = vpop.f32.mrf.mxu1 }
 0x1a9   :  { %v229_v20 = vadd.f32 %v302_v19, %v142_v18 }
 0x1aa   :  { %v223_v21 = vpop.f32.mrf.mxu1 }
 0x1ab   :  { %v233_v23 = vmax.f32 %v229_v20, 0.0  ;;  %v224_v24 = vadd.f32 %v223_v21, %v138_v17 }
 0x1ad   :  { %v232_v26 = vmax.f32 %v224_v24, 0.0  ;;  %v243_v27 = vmul.f32 %v240_v22, %v233_v23 }
 0x1af   :  { %v242_v28 = vmul.f32 %v236_v25, %v232_v26  ;;  %v247_v29 = vsel %vm246_vm3, %v243_v27, 0.0 }
 0x1b1   :  { %v245_v30 = vsel %vm244_vm4, %v242_v28, 0.0 }
 0x1b2   :  { %v248_v31 = vadd.f32 %v247_v29, %v245_v30 }
 0x1b4   :  { %v249_v32 = vrot.slane %v248_v31, 4 }
 0x1b6   :  { %v250_v33 = vadd.f32 %v249_v32, %v248_v31 }
 0x1b8   :  { %v251_v34 = vrot.slane %v250_v33, 2 }
 0x1ba   :  { %v252_v35 = vadd.f32 %v251_v34, %v250_v33 }
 0x1bc   :  { %v253_v36 = vrot.slane %v252_v35, 1 }
 0x1be   :  { %v254_v38 = vadd.f32 %v253_v36, %v252_v35 }
 0x1c0   :  { %v259_v39 = vadd.f32 %v257_v37, %v254_v38 }
 0x1c2   :  { %261 = vst.msk [vmem:[#allocation7] sm:$0x1] %vm260_vm5, %v259_v39 }
 0x1c3   :  { %371 = shalt.err (!%p368_p0)
}
 0x1c4   :  { %271 = dma.vmem_to_hbm [thread:$0]  %s269_s21, 16, %s424_s2, [#allocation4]  }
 0x1c5   :  { %384 = dma.done.wait [#allocation4], 16  }
 0x1c6   :  { %385 = vsyncadd [#allocation4], 4294967280 }
 0x1c7   :  { %275 = vsyncpa [#allocation3], 1 }
 0x1c8   :  { %276 = vsyncpa [#allocation6], 1 }
 0x1c9   :  { %277 = vsyncpa [#allocation4], 1 }

</bundles_post_ra>
